<compile_context>
chip_gen: v7x
topology: tpu7x:2x2x1
jax: 0.10.0
libtpu: 0.0.40
codegen_flags: <defaults>
</compile_context>

<pallas_src>
import jax
import jax.numpy as jnp
from jax import lax
from jax.experimental import pallas as pl
from jax.experimental.pallas import tpu as pltpu


_DN = (((1,), (1,)), ((), ()))  # contract x's dim 1 with weight's dim 1 (In axis)


def _gxi_zero_ref_kernel(x_ref, w_ref, b_ref, y_out, yref_out, acc):
    """y = x @ W^T + b ; y_ref = b (zeros baseline => reference matmul elided)."""
    k = pl.program_id(2)

    @pl.when(k == 0)
    def _():
        acc[...] = jnp.zeros_like(acc)

    acc[...] += lax.dot_general(
        x_ref[...], w_ref[...], dimension_numbers=_DN,
        preferred_element_type=jnp.float32)

    @pl.when(k == pl.num_programs(2) - 1)
    def _():
        b = b_ref[...]                                   # (1, tn)
        y_out[...] = (acc[...] + b).astype(y_out.dtype)
        yref_out[...] = jnp.broadcast_to(b, yref_out.shape).astype(yref_out.dtype)


def _gxi_general_kernel(x_ref, xr_ref, w_ref, b_ref, y_out, yref_out, acc, accr):
    """y = x @ W^T + b ; y_ref = ref(x) @ W^T + b, one W tile feeding both dots."""
    k = pl.program_id(2)

    @pl.when(k == 0)
    def _():
        acc[...] = jnp.zeros_like(acc)
        accr[...] = jnp.zeros_like(accr)

    w = w_ref[...]                                       # single load, shared
    acc[...] += lax.dot_general(
        x_ref[...], w, dimension_numbers=_DN, preferred_element_type=jnp.float32)
    accr[...] += lax.dot_general(
        xr_ref[...], w, dimension_numbers=_DN, preferred_element_type=jnp.float32)

    @pl.when(k == pl.num_programs(2) - 1)
    def _():
        b = b_ref[...]                                   # (1, tn)
        y_out[...] = (acc[...] + b).astype(y_out.dtype)
        yref_out[...] = (accr[...] + b).astype(yref_out.dtype)


def _round_up(a, m):
    return ((a + m - 1) // m) * m


def gradient_x_input_reference_forward(x, weight, bias_vec, ref_fn, *,
                                       zero_reference=None):
    """Forward of GradientxInputReferenceModule wrapping nn.Linear.

    x:        (B, in_features) float32
    weight:   (out_features, in_features) float32   (PyTorch nn.Linear layout)
    bias_vec: (out_features,) float32
    ref_fn:   callable producing the reference/baseline input (same shape as x)
    zero_reference: force/skip the zeros-baseline fast path (auto-detected when
                    ref_fn is jnp.zeros_like).

    Returns (y, y_ref): module(x) and module(ref_fn(x)); y is what the PyTorch
    module's forward returns.
    """
    B, In = x.shape
    Out, In_w = weight.shape
    assert In_w == In, "weight must be (out_features, in_features)"
    if zero_reference is None:
        zero_reference = ref_fn is jnp.zeros_like

    # Tile sizes: lane-dense (multiple of 128) on Out/In, sublane multiple of 8
    # on batch.  Budgeted for v7x's 64 MiB VMEM with 2-deep pipelining.
    tm = min(256, _round_up(B, 8))
    tn = min(512, _round_up(Out, 128))
    tk = min(512, _round_up(In, 128))

    Bp = _round_up(B, tm)
    Inp = _round_up(In, tk)
    Outp = _round_up(Out, tn)

    xp = x if (Bp, Inp) == (B, In) else jnp.pad(x, ((0, Bp - B), (0, Inp - In)))
    wp = (weight if (Outp, Inp) == (Out, In)
          else jnp.pad(weight, ((0, Outp - Out), (0, Inp - In))))
    bp = bias_vec if Outp == Out else jnp.pad(bias_vec, (0, Outp - Out))
    b2 = bp.reshape(1, Outp)

    grid = (Bp // tm, Outp // tn, Inp // tk)

    x_spec = pl.BlockSpec((tm, tk), lambda i, j, k: (i, k))
    w_spec = pl.BlockSpec((tn, tk), lambda i, j, k: (j, k))   # (Out, In) layout
    b_spec = pl.BlockSpec((1, tn), lambda i, j, k: (0, j))
    y_spec = pl.BlockSpec((tm, tn), lambda i, j, k: (i, j))

    out_shape = (jax.ShapeDtypeStruct((Bp, Outp), x.dtype),
                 jax.ShapeDtypeStruct((Bp, Outp), x.dtype))

    cparams = pltpu.CompilerParams(
        dimension_semantics=("parallel", "parallel", "arbitrary"),
        vmem_limit_bytes=32 * 1024 * 1024)

    if zero_reference:
        y_p, yref_p = pl.pallas_call(
            _gxi_zero_ref_kernel,
            out_shape=out_shape,
            grid_spec=pltpu.PrefetchScalarGridSpec(
                num_scalar_prefetch=0,
                grid=grid,
                in_specs=[x_spec, w_spec, b_spec],
                out_specs=[y_spec, y_spec],
                scratch_shapes=[pltpu.VMEM((tm, tn), jnp.float32)]),
            compiler_params=cparams,
        )(xp, wp, b2)
    else:
        xr = ref_fn(x)
        xrp = (xr if (Bp, Inp) == (B, In)
               else jnp.pad(xr, ((0, Bp - B), (0, Inp - In))))
        y_p, yref_p = pl.pallas_call(
            _gxi_general_kernel,
            out_shape=out_shape,
            grid_spec=pltpu.PrefetchScalarGridSpec(
                num_scalar_prefetch=0,
                grid=grid,
                in_specs=[x_spec, x_spec, w_spec, b_spec],
                out_specs=[y_spec, y_spec],
                scratch_shapes=[pltpu.VMEM((tm, tn), jnp.float32),
                                pltpu.VMEM((tm, tn), jnp.float32)]),
            compiler_params=cparams,
        )(xp, xrp, wp, b2)

    y = y_p[:B, :Out]
    y_ref = yref_p[:B, :Out]
    return y, y_ref


if __name__ == "__main__":
    key = jax.random.PRNGKey(0)
    k_x, k_w, k_b = jax.random.split(key, 3)

    B, In, Out = 8, 32, 16          # small shapes: batch/seq=8, hidden=32 -> 16
    x = jax.random.normal(k_x, (B, In), dtype=jnp.float32)

    # Deterministic synthetic nn.Linear parameters (no checkpoint load).
    weight = jax.random.normal(k_w, (Out, In), dtype=jnp.float32) * 0.1
    bias_vec = jax.random.normal(k_b, (Out,), dtype=jnp.float32) * 0.1

    # --- zeros baseline (fast path: reference matmul / x_ref DMA elided) ---
    ref_fn_zero = jnp.zeros_like
    y, y_ref = gradient_x_input_reference_forward(x, weight, bias_vec, ref_fn_zero)
    jax.block_until_ready((y, y_ref))

    y_expect = x @ weight.T + bias_vec
    yr_expect = ref_fn_zero(x) @ weight.T + bias_vec
    assert jnp.allclose(y, y_expect, atol=1e-5, rtol=1e-5)
    assert jnp.allclose(y_ref, yr_expect, atol=1e-5, rtol=1e-5)

    # --- general reference baseline (shared-weight dual-matmul path) ---
    ref_fn_gen = lambda t: 0.5 * t
    y2, y2_ref = gradient_x_input_reference_forward(x, weight, bias_vec, ref_fn_gen)
    jax.block_until_ready((y2, y2_ref))

    y2_expect = x @ weight.T + bias_vec
    y2r_expect = ref_fn_gen(x) @ weight.T + bias_vec
    assert jnp.allclose(y2, y2_expect, atol=1e-5, rtol=1e-5)
    assert jnp.allclose(y2_ref, y2r_expect, atol=1e-5, rtol=1e-5)

    print("KERNEL_OK")
</pallas_src>

<mosaic_0001>
module attributes {stable_mosaic.version = 11 : i64} {
  func.func @_gxi_zero_ref_kernel(%arg0: i32, %arg1: i32, %arg2: i32, %arg3: memref<8x128xf32, #tpu.memory_space<vmem>>, %arg4: memref<128x128xf32, #tpu.memory_space<vmem>>, %arg5: memref<1x128xf32, #tpu.memory_space<vmem>>, %arg6: memref<8x128xf32, #tpu.memory_space<vmem>>, %arg7: memref<8x128xf32, #tpu.memory_space<vmem>>, %arg8: memref<8x128xf32, #tpu.memory_space<vmem>>) attributes {dimension_semantics = [#tpu.dimension_semantics<parallel>, #tpu.dimension_semantics<parallel>, #tpu.dimension_semantics<arbitrary>], iteration_bounds = array<i64: 1, 1, 1>, scalar_prefetch = 0 : i64, scratch_operands = 1 : i64, tpu.core_type = #tpu.core_type<tc>, window_params = [{transform_indices = @transform_0, window_bounds = array<i64: 8, 128>}, {transform_indices = @transform_1, window_bounds = array<i64: 128, 128>}, {transform_indices = @transform_2, window_bounds = array<i64: 1, 128>}, {transform_indices = @transform_3, window_bounds = array<i64: 8, 128>}, {transform_indices = @transform_4, window_bounds = array<i64: 8, 128>}]} {
    %c0_i32 = arith.constant 0 : i32
    %0 = arith.cmpi eq, %arg2, %c0_i32 : i32
    %1 = arith.extui %0 : i1 to i32
    %c0_i32_0 = arith.constant 0 : i32
    %2 = arith.cmpi ne, %1, %c0_i32_0 : i32
    scf.if %2 {
      %cst_10 = arith.constant 0.000000e+00 : f32
      %12 = vector.broadcast %cst_10 : f32 to vector<8x128xf32>
      %c0_11 = arith.constant 0 : index
      %c0_12 = arith.constant 0 : index
      %13 = vector.load %arg8[%c0_11, %c0_12] : memref<8x128xf32, #tpu.memory_space<vmem>>, vector<8x128xf32>
      tpu.vector_store %arg8[%c0_11, %c0_12], %12 {strides = array<i32>} : memref<8x128xf32, #tpu.memory_space<vmem>>, vector<8x128xf32>,
    } else {
    }
    %c0 = arith.constant 0 : index
    %c0_1 = arith.constant 0 : index
    %3 = vector.load %arg8[%c0, %c0_1] : memref<8x128xf32, #tpu.memory_space<vmem>>, vector<8x128xf32>
    %c0_2 = arith.constant 0 : index
    %c0_3 = arith.constant 0 : index
    %4 = vector.load %arg3[%c0_2, %c0_3] : memref<8x128xf32, #tpu.memory_space<vmem>>, vector<8x128xf32>
    %c0_4 = arith.constant 0 : index
    %c0_5 = arith.constant 0 : index
    %5 = vector.load %arg4[%c0_4, %c0_5] : memref<128x128xf32, #tpu.memory_space<vmem>>, vector<128x128xf32>
    %cst = arith.constant dense<0.000000e+00> : vector<8x128xf32>
    %6 = tpu.matmul %4, %5, %cst {dimension_numbers = #tpu.dot_dimension_numbers<[1], [1], [0], [0], [0, 0, 1, 0], [], []>} : vector<8x128xf32>, vector<128x128xf32>, vector<8x128xf32> -> vector<8x128xf32>
    %7 = arith.addf %3, %6 : vector<8x128xf32>
    %c0_6 = arith.constant 0 : index
    %c0_7 = arith.constant 0 : index
    %8 = vector.load %arg8[%c0_6, %c0_7] : memref<8x128xf32, #tpu.memory_space<vmem>>, vector<8x128xf32>
    tpu.vector_store %arg8[%c0_6, %c0_7], %7 {strides = array<i32>} : memref<8x128xf32, #tpu.memory_space<vmem>>, vector<8x128xf32>,
    %c0_i32_8 = arith.constant 0 : i32
    %9 = arith.cmpi eq, %arg2, %c0_i32_8 : i32
    %10 = arith.extui %9 : i1 to i32
    %c0_i32_9 = arith.constant 0 : i32
    %11 = arith.cmpi ne, %10, %c0_i32_9 : i32
    scf.if %11 {
      %c0_10 = arith.constant 0 : index
      %c0_11 = arith.constant 0 : index
      %12 = vector.load %arg5[%c0_10, %c0_11] : memref<1x128xf32, #tpu.memory_space<vmem>>, vector<1x128xf32>
      %c0_12 = arith.constant 0 : index
      %c0_13 = arith.constant 0 : index
      %13 = vector.load %arg8[%c0_12, %c0_13] : memref<8x128xf32, #tpu.memory_space<vmem>>, vector<8x128xf32>
      %14 = vector.broadcast %12 : vector<1x128xf32> to vector<8x128xf32>
      %15 = arith.addf %13, %14 : vector<8x128xf32>
      %c0_14 = arith.constant 0 : index
      %c0_15 = arith.constant 0 : index
      %16 = vector.load %arg6[%c0_14, %c0_15] : memref<8x128xf32, #tpu.memory_space<vmem>>, vector<8x128xf32>
      tpu.vector_store %arg6[%c0_14, %c0_15], %15 {strides = array<i32>} : memref<8x128xf32, #tpu.memory_space<vmem>>, vector<8x128xf32>,
      %17 = vector.shape_cast %12 : vector<1x128xf32> to vector<1x128xf32>
      %18 = vector.broadcast %17 : vector<1x128xf32> to vector<8x128xf32>
      %c0_16 = arith.constant 0 : index
      %c0_17 = arith.constant 0 : index
      %19 = vector.load %arg7[%c0_16, %c0_17] : memref<8x128xf32, #tpu.memory_space<vmem>>, vector<8x128xf32>
      tpu.vector_store %arg7[%c0_16, %c0_17], %18 {strides = array<i32>} : memref<8x128xf32, #tpu.memory_space<vmem>>, vector<8x128xf32>,
    } else {
    }
    return
  }
  func.func @transform_0(%arg0: i32, %arg1: i32, %arg2: i32) -> (i32, i32) {
    %c0_i32 = arith.constant 0 : i32
    return %arg0, %arg2 : i32, i32
  }
  func.func @transform_1(%arg0: i32, %arg1: i32, %arg2: i32) -> (i32, i32) {
    %c0_i32 = arith.constant 0 : i32
    return %arg1, %arg2 : i32, i32
  }
  func.func @transform_2(%arg0: i32, %arg1: i32, %arg2: i32) -> (i32, i32) {
    %c0_i32 = arith.constant 0 : i32
    %c0_i32_0 = arith.constant 0 : i32
    return %c0_i32, %arg1 : i32, i32
  }
  func.func @transform_3(%arg0: i32, %arg1: i32, %arg2: i32) -> (i32, i32) {
    %c0_i32 = arith.constant 0 : i32
    return %arg0, %arg1 : i32, i32
  }
  func.func @transform_4(%arg0: i32, %arg1: i32, %arg2: i32) -> (i32, i32) {
    %c0_i32 = arith.constant 0 : i32
    return %arg0, %arg1 : i32, i32
  }
}

</mosaic_0001>

<bundles_post_ra>
// kernel: tpu_custom_call.1
= control target key start
LH: loop header
LB: loop body
LE: loop exit
PB: predicated region body
PF: predicated region fallthrough
CT: control target
= control target key end

     0   :  { %10 = vsyncpa [#allocation4], 0  ;;  %s457_s0 = inlined_call_operand.hbm [shape: f32[8,128], index: 0, kind: input, shape index: {}]   ;;  %s458_s1 = inlined_call_operand.hbm [shape: f32[128,128], index: 1, kind: input, shape index: {}]   ;;  %s459_s2 = inlined_call_operand.vmem [shape: f32[1,128], index: 2, kind: input, shape index: {}]   ;;  %s460_s3 = inlined_call_operand.hbm [shape: f32[8,128], index: 3, kind: output, shape index: {0}]   ;;  %s461_s4 = inlined_call_operand.hbm [shape: f32[8,128], index: 4, kind: output, shape index: {1}]  }
   0x1   :  { %11 = vsyncpa [#allocation7], 0 }
   0x2   :  { %12 = vsyncpa [#allocation5], 0 }
   0x3   :  { %13 = vsyncpa [#allocation10], 0  ;;  %s365_s15 = smov [#allocation3]   ;;  %s366_s17 = smov [#allocation6]  }
   0x4   :  { %s20_s16 = sshll.u32 %s365_s15, 4  ;;  %s29_s18 = sshll.u32 %s366_s17, 4  ;;  %s21_s16 = int_to_ptr.vmem [resolvable:$true] %s20_s16  ;;  %s399_s18 = int_to_ptr.vmem [resolvable:$true] %s29_s18 }
   0x5   :  { %s269_s21 = scalar_lea.hbm %s457_s0, 128 }
   0x6   :  { %p270_p0 = scmp.ne.s32.totalorder %s457_s0, %s269_s21  ;;  %p273_p1 = scmp.lt.u32.totalorder %s269_s21, %s457_s0 }
   0x8   :  { %p275_p2 = pnand %p273_p1, %p270_p0 }
   0xa   :  { %278 = shalt.err (!%p275_p2)
}
   0xb   :  { %s279_s26 = scalar_lea.vmem %s21_s16, 128  ;;  %p284_p4 = scmp.lt.s32.totalorder %s21_s16, %s21_s16 }
   0xc   :  { %p280_p3 = scmp.ne.s32.totalorder %s21_s16, %s279_s26  ;;  %p285_p5 = scmp.lt.s32.totalorder %s279_s26, %s279_s26 }
   0xe   :  { %p286_p6 = por %p285_p5, %p284_p4 }
  0x10   :  { %p287_p7 = pnand %p286_p6, %p280_p3 }
  0x12   :  { %290 = shalt.err (!%p287_p7)
}
  0x13   :  { %23 = dma.hbm_to_vmem [thread:$0]  %s457_s0, 128, %s21_s16, [#allocation4]  }
  0x14   :  { %s291_s5 = scalar_lea.hbm %s458_s1, 2048 }
  0x15   :  { %p292_p8 = scmp.ne.s32.totalorder %s458_s1, %s291_s5  ;;  %p295_p9 = scmp.lt.u32.totalorder %s291_s5, %s458_s1 }
  0x17   :  { %p297_p10 = pnand %p295_p9, %p292_p8 }
  0x19   :  { %300 = shalt.err (!%p297_p10)
}
  0x1a   :  { %s301_s10 = scalar_lea.vmem %s399_s18, 2048  ;;  %p306_p12 = scmp.lt.s32.totalorder %s399_s18, %s399_s18 }
  0x1b   :  { %p302_p11 = scmp.ne.s32.totalorder %s399_s18, %s301_s10  ;;  %p307_p13 = scmp.lt.s32.totalorder %s301_s10, %s301_s10 }
  0x1d   :  { %p308_p0 = por %p307_p13, %p306_p12 }
  0x1f   :  { %p309_p1 = pnand %p308_p0, %p302_p11 }
  0x21   :  { %312 = shalt.err (!%p309_p1)
}
  0x22   :  { %s367_s0 = smov 128   ;;  %s368_s11 = smov 8  }
  0x23   :  { %35 = dma.hbm_to_vmem [thread:$0]  %s458_s1, 2048, %s399_s18, [#allocation7], %s367_s0, %s367_s0, %s368_s11  }
  0x24   :  { %357 = dma.done.wait [#allocation4], 128  }
  0x25   :  { %358 = vsyncadd [#allocation4], 4294967168 }
  0x26   :  { %359 = dma.done.wait [#allocation7], 2048  }
  0x27   :  { %360 = vsyncadd [#allocation7], 4294965248  ;;  %v369_v0 = vmov 0.0|0.0   ;;  %vm370_vm0 = vmmov 0   ;;  %v371_v1 = vmov 0.0   ;;  %v51_v2 = vld [vmem:[#allocation6] sm:$0xff] }
  0x28   :  { %236 = vmatprep.subr.bf16.mxu0 %v369_v0  ;;  %233 = vmatprep.mubr.msk.f32.mxu0 %vm370_vm0, %v371_v1  ;;  %v52_v3 = vld [vmem:[#allocation6 + $0x8] sm:$0xff]  ;;  %v53_v5 = vld [vmem:[#allocation6 + $0x10] sm:$0xff]  ;;  %v54_v6 = vld [vmem:[#allocation6 + $0x18] sm:$0xff]  ;;  %s372_s15 = smov [#allocation9]  }
  0x29   :  { %v237_v4 = vpack.c.bf16 %v52_v3, %v51_v2  ;;  %v240_v7 = vpack.c.bf16 %v54_v6, %v53_v5  ;;  %v55_v8 = vld [vmem:[#allocation6 + $0x20] sm:$0xff]  ;;  %v56_v9 = vld [vmem:[#allocation6 + $0x28] sm:$0xff]  ;;  %v57_v11 = vld [vmem:[#allocation6 + $0x30] sm:$0xff]  ;;  %s169_s16 = sshll.u32 %s372_s15, 4  ;;  %s170_s16 = int_to_ptr.vmem [resolvable:$true] %s169_s16 }
  0x2a   :  { %v243_v10 = vpack.c.bf16 %v56_v9, %v55_v8  ;;  %v58_v12 = vld [vmem:[#allocation6 + $0x38] sm:$0xff]  ;;  %v59_v14 = vld [vmem:[#allocation6 + $0x40] sm:$0xff]  ;;  %v60_v15 = vld [vmem:[#allocation6 + $0x48] sm:$0xff]  ;;  %s313_s17 = scalar_lea.vmem %s170_s16, 128  ;;  %p318_p3 = scmp.lt.s32.totalorder %s170_s16, %s170_s16 }
  0x2b   :  { %238 = vmatpush3.bf16.xpose.msra.mxu0 %v237_v4  ;;  %v246_v13 = vpack.c.bf16 %v58_v12, %v57_v11  ;;  %v249_v16 = vpack.c.bf16 %v60_v15, %v59_v14  ;;  %v61_v17 = vld [vmem:[#allocation6 + $0x50] sm:$0xff]  ;;  %v62_v18 = vld [vmem:[#allocation6 + $0x58] sm:$0xff]  ;;  %v63_v20 = vld [vmem:[#allocation6 + $0x60] sm:$0xff]  ;;  %p314_p2 = scmp.ne.s32.totalorder %s170_s16, %s313_s17  ;;  %p319_p4 = scmp.lt.s32.totalorder %s313_s17, %s313_s17 }
  0x2c   :  { %239 = vmatprep.subr.bf16.mxu0 %v369_v0  ;;  %v252_v19 = vpack.c.bf16 %v62_v18, %v61_v17  ;;  %v64_v21 = vld [vmem:[#allocation6 + $0x68] sm:$0xff]  ;;  %v65_v23 = vld [vmem:[#allocation6 + $0x70] sm:$0xff]  ;;  %v66_v24 = vld [vmem:[#allocation6 + $0x78] sm:$0xff] }
  0x2d   :  { %v255_v22 = vpack.c.bf16 %v64_v21, %v63_v20  ;;  %v258_v25 = vpack.c.bf16 %v66_v24, %v65_v23  ;;  %v50_v26 = vld [vmem:[#allocation3] sm:$0xff]  ;;  %p320_p5 = por %p319_p4, %p318_p3 }
  0x2e   :  { %v183_v27 = vld [vmem:[%s459_s2] ss:$0 sm:$0xff] }
  0x2f   :  { %152 = vst [vmem:[#allocation9] sm:$0xff] %v183_v27  ;;  %p321_p6 = pnand %p320_p5, %p314_p2 }
  0x33   :  { %241 = vmatpush3.bf16.xpose.msra.mxu0 %v240_v7 }
  0x34   :  { %242 = vmatprep.subr.bf16.mxu0 %v369_v0 }
  0x3b   :  { %244 = vmatpush3.bf16.xpose.msra.mxu0 %v243_v10 }
  0x3c   :  { %245 = vmatprep.subr.bf16.mxu0 %v369_v0 }
  0x43   :  { %247 = vmatpush3.bf16.xpose.msra.mxu0 %v246_v13 }
  0x44   :  { %248 = vmatprep.subr.bf16.mxu0 %v369_v0 }
  0x4b   :  { %250 = vmatpush3.bf16.xpose.msra.mxu0 %v249_v16 }
  0x4c   :  { %251 = vmatprep.subr.bf16.mxu0 %v369_v0 }
  0x53   :  { %253 = vmatpush3.bf16.xpose.msra.mxu0 %v252_v19 }
  0x54   :  { %254 = vmatprep.subr.bf16.mxu0 %v369_v0 }
  0x5b   :  { %256 = vmatpush3.bf16.xpose.msra.mxu0 %v255_v22 }
  0x5c   :  { %257 = vmatprep.subr.bf16.mxu0 %v369_v0 }
  0x63   :  { %259 = vmatpush3.bf16.xpose.msra.mxu0 %v258_v25 }
  0x6a   :  { %234 = vmatmul.mubr.f32.vlgmr.msra.gmra.mrb[0].mxu0 %v50_v26 }
  0x6b   :  { %324 = shalt.err (!%p321_p6)
}
  0x6c   :  { %s325_s20 = scalar_lea.hbm %s461_s4, 128 }
  0x6d   :  { %p326_p7 = scmp.ne.s32.totalorder %s461_s4, %s325_s20  ;;  %p329_p8 = scmp.lt.u32.totalorder %s325_s20, %s461_s4 }
  0x6f   :  { %p331_p9 = pnand %p329_p8, %p326_p7 }
  0x71   :  { %334 = shalt.err (!%p331_p9)
}
  0x72   :  { %172 = dma.vmem_to_hbm [thread:$0]  %s170_s16, 128, %s461_s4, [#allocation10]  }
  0x73   :  { %s373_s26 = smov [#allocation8]  }
  0x74   :  { %s159_s27 = sshll.u32 %s373_s26, 4  ;;  %s160_s27 = int_to_ptr.vmem [resolvable:$true] %s159_s27 }
  0x75   :  { %s335_s28 = scalar_lea.vmem %s160_s27, 128  ;;  %p340_p11 = scmp.lt.s32.totalorder %s160_s27, %s160_s27 }
  0x76   :  { %p336_p10 = scmp.ne.s32.totalorder %s160_s27, %s335_s28  ;;  %p341_p12 = scmp.lt.s32.totalorder %s335_s28, %s335_s28 }
  0x78   :  { %p342_p13 = por %p341_p12, %p340_p11 }
  0x7a   :  { %p343_p0 = pnand %p342_p13, %p336_p10 }
 0x13d   :  { %v133_v28 = vpop.f32.mrb[0].mxu0 }
 0x13e   :  { %v150_v29 = vadd.f32 %v183_v27, %v133_v28  ;;  %v235_v30 = vpop.f32.mrb[1].mxu0 }
 0x140   :  { %151 = vst [vmem:[#allocation8] sm:$0xff] %v150_v29 }
 0x141   :  { %346 = shalt.err (!%p343_p0)
}
 0x142   :  { %s347_s5 = scalar_lea.hbm %s460_s3, 128 }
 0x143   :  { %p348_p1 = scmp.ne.s32.totalorder %s460_s3, %s347_s5  ;;  %p351_p2 = scmp.lt.u32.totalorder %s347_s5, %s460_s3 }
 0x145   :  { %p353_p3 = pnand %p351_p2, %p348_p1 }
 0x147   :  { %356 = shalt.err (!%p353_p3)
}
 0x148   :  { %162 = dma.vmem_to_hbm [thread:$0]  %s160_s27, 128, %s460_s3, [#allocation5]  }
 0x149   :  { %361 = dma.done.wait [#allocation5], 128  }
 0x14a   :  { %362 = vsyncadd [#allocation5], 4294967168 }
 0x14b   :  { %363 = dma.done.wait [#allocation10], 128  }
 0x14c   :  { %364 = vsyncadd [#allocation10], 4294967168 }
 0x14d   :  { %179 = vsyncpa [#allocation4], 1 }
 0x14e   :  { %180 = vsyncpa [#allocation7], 1 }
 0x14f   :  { %181 = vsyncpa [#allocation5], 1 }
 0x150   :  { %182 = vsyncpa [#allocation10], 1 }

</bundles_post_ra>
